<compile_context>
chip_gen: v5e
topology: v5e:2x2
jax: 0.10.0
libtpu: 0.0.40
codegen_flags: <defaults>
</compile_context>

<pallas_src>
import functools

import jax
import jax.numpy as jnp
from jax import lax
from jax.experimental import pallas as pl
from jax.experimental.pallas import tpu as pltpu


def _round_up(v, m):
    return ((v + m - 1) // m) * m


def _largest_aligned_divisor(dim, unit, cap):
    """Largest multiple of `unit` that divides `dim` (dim % unit == 0) and is <= cap."""
    cap = max(unit, min(cap, dim))
    best = unit
    for t in range(unit, cap + 1, unit):
        if dim % t == 0:
            best = t
    return best


def _pad2(a, rows, cols):
    pr, pc = rows - a.shape[0], cols - a.shape[1]
    if pr == 0 and pc == 0:
        return a
    return jnp.pad(a, ((0, pr), (0, pc)))


def _lora_linear_kernel(rank, rank1_epilogue,
                        x_ref, w_ref, bias_ref, xb_ref, la_ref,
                        o_ref, acc_ref):
    # x_ref:   (tm, tk)  input tile
    # w_ref:   (tn, tk)  weight tile, NATIVE (N, K) layout
    # bias_ref:(1,  tn)  f32
    # xb_ref:  (tm, r)   precomputed scaling * (x @ B.T) row block, f32
    # la_ref:  (r,  tn)  lora_A.T tile, f32
    # acc_ref: (tm, tn)  f32 accumulator (persists across k)
    k = pl.program_id(2)
    nk = pl.num_programs(2)

    @pl.when(k == 0)
    def _init():
        acc_ref[...] = jnp.zeros_like(acc_ref)

    # Base matmul: contract x and native-layout W along their last (K) axis —
    # no wrapper-side transpose of the weight, no in-kernel relayout copies.
    acc_ref[...] += lax.dot_general(
        x_ref[...], w_ref[...],
        dimension_numbers=(((1,), (1,)), ((), ())),
        preferred_element_type=jnp.float32,
    )

    # Epilogue: bias + LoRA up-projection (scaling already folded into xb),
    # single lane-dense cast + store.
    @pl.when(k == nk - 1)
    def _epilogue():
        xb = xb_ref[...]
        la = la_ref[...]
        if rank1_epilogue:
            # Small r: r unrolled rank-1 VPU FMAs — keeps the MXU free and
            # avoids a mostly-idle depth-r systolic pass.
            lora = xb[:, 0:1] * la[0:1, :]
            for h in range(1, rank):
                lora = lora + xb[:, h:h + 1] * la[h:h + 1, :]
        else:
            lora = jnp.dot(xb, la, preferred_element_type=jnp.float32)
        o_ref[...] = (acc_ref[...] + bias_ref[...] + lora).astype(o_ref.dtype)


def lora_linear(x, w, bias, lora_A, lora_B, scaling, *,
                tm_max=512, tn_max=1024, tk_max=1024):
    """x: (M, K); w: (N, K); bias: (N,); lora_A: (N, r); lora_B: (r, K)."""
    M, K = x.shape
    N = w.shape[0]
    r = lora_A.shape[1]
    out_dtype = x.dtype

    # Hardware alignment only (not tile-size padding): 16-sublane packing for
    # bf16, 8 otherwise; 128 lanes.
    sub = 16 if x.dtype == jnp.bfloat16 else 8
    Mp = _round_up(M, sub)
    Np = _round_up(N, 128)
    Kp = _round_up(K, 128)

    # Divisor-based tile selection: largest aligned divisor of each rounded dim
    # under the per-generation caps (defaults sized to fit v7x's 64 MiB VMEM).
    tm = _largest_aligned_divisor(Mp, sub, tm_max)
    tn = _largest_aligned_divisor(Np, 128, tn_max)
    tk = _largest_aligned_divisor(Kp, 128, tk_max)

    # LoRA down-projection precomputed in the wrapper (skinny O(M*K*r) matmul),
    # with scaling folded in.  Removes all cross-j state from the kernel.
    # TODO(synk): training-mode dropout would mask x here before this matmul.
    xb = (scaling * jnp.dot(x, lora_B.T)).astype(jnp.float32)        # (M, r)

    x_p = _pad2(x, Mp, Kp)
    w_p = _pad2(w, Np, Kp)                                           # native (N, K)
    bias_p = _pad2(bias.reshape(1, N).astype(jnp.float32), 1, Np)    # (1,  Np)
    xb_p = _pad2(xb, Mp, r)                                          # (Mp, r)
    laT_p = _pad2(lora_A.T.astype(jnp.float32), r, Np)               # (r,  Np)

    grid = (Mp // tm, Np // tn, Kp // tk)
    grid_m, _, grid_k = grid

    # Weight spec: native layout, indexed (j, k).  In the decode regime (one M
    # tile, multiple K steps) the kernel is DMA-bound on the weight stream, so
    # deepen its pipelining.
    w_index_map = lambda i, j, k: (j, k)
    w_spec = pl.BlockSpec((tn, tk), w_index_map)
    if grid_m == 1 and grid_k >= 2:
        try:
            w_spec = pl.BlockSpec((tn, tk), w_index_map,
                                  pipeline_mode=pl.Buffered(3))
        except TypeError:  # older JAX without pipeline_mode on BlockSpec
            pass

    # Conservative VMEM budget: keep <= 48 MiB so the same config runs on
    # v7x (64 MiB/TC) as well as v5e/v6e (128 MiB).
    itemsize = jnp.dtype(x.dtype).itemsize
    est = (2 * ((tm * tk + tn * tk) * itemsize          # x, W tiles (double-buffered)
                + (tn + tm * r + r * tn) * 4            # bias, xb, lora_A.T
                + tm * tn * itemsize)                   # output tile
           + tm * tn * 4)                               # f32 accumulator scratch
    vmem_limit = min(48 * 1024 * 1024, max(32 * 1024 * 1024, int(1.5 * est)))

    kernel = functools.partial(_lora_linear_kernel, r, r <= 16)

    out_p = pl.pallas_call(
        kernel,
        out_shape=jax.ShapeDtypeStruct((Mp, Np), out_dtype),
        grid_spec=pltpu.PrefetchScalarGridSpec(
            num_scalar_prefetch=0,
            grid=grid,
            in_specs=[
                pl.BlockSpec((tm, tk), lambda i, j, k: (i, k)),   # x
                w_spec,                                           # W (native N, K)
                pl.BlockSpec((1, tn), lambda i, j, k: (0, j)),    # bias
                pl.BlockSpec((tm, r), lambda i, j, k: (i, 0)),    # xb = s*(x @ B.T)
                pl.BlockSpec((r, tn), lambda i, j, k: (0, j)),    # lora_A.T
            ],
            out_specs=pl.BlockSpec((tm, tn), lambda i, j, k: (i, j)),
            scratch_shapes=[
                pltpu.VMEM((tm, tn), jnp.float32),   # base-matmul accumulator
            ],
        ),
        compiler_params=pltpu.CompilerParams(
            # No cross-j state any more, so both M and N tiles can be sharded
            # across TensorCores (v7x megacore); K carries the accumulator.
            dimension_semantics=("parallel", "parallel", "arbitrary"),
            vmem_limit_bytes=vmem_limit,
        ),
    )(x_p, w_p, bias_p, xb_p, laT_p)

    if Mp == M and Np == N:
        return out_p
    return out_p[:M, :N]


def _reference(x, w, bias, lora_A, lora_B, scaling):
    return x @ w.T + bias + scaling * ((x @ lora_B.T) @ lora_A.T)


if __name__ == "__main__":
    key = jax.random.PRNGKey(0)

    # --- Test 1: small shapes consistent with the module (batch=8, in=32, out=64, r=4)
    batch, in_features, out_features, r = 8, 32, 64, 4
    lora_alpha = 8
    scaling = lora_alpha / r

    kx, kw, kb, ka, kB = jax.random.split(key, 5)
    x = jax.random.normal(kx, (batch, in_features), dtype=jnp.float32)
    w = jax.random.normal(kw, (out_features, in_features), dtype=jnp.float32) * 0.1
    bias = jax.random.normal(kb, (out_features,), dtype=jnp.float32) * 0.1
    lora_A = jax.random.normal(ka, (out_features, r), dtype=jnp.float32) * 0.01
    lora_B = jax.random.normal(kB, (r, in_features), dtype=jnp.float32) * 0.01

    out = jax.block_until_ready(lora_linear(x, w, bias, lora_A, lora_B, scaling))
    ref = _reference(x, w, bias, lora_A, lora_B, scaling)
    assert jnp.allclose(out, ref, atol=1e-4, rtol=1e-4), "mismatch vs reference (small)"

    # --- Test 2: multi-tile grid (2 x 5 x 3 with the caps below) exercising the
    #             divisor-based tiling, k-accumulation and the epilogue.
    M2, K2, N2, r2 = 256, 768, 1280, 8
    scaling2 = 16 / r2
    k1, k2, k3, k4, k5 = jax.random.split(jax.random.PRNGKey(1), 5)
    x2 = jax.random.normal(k1, (M2, K2), dtype=jnp.float32)
    w2 = jax.random.normal(k2, (N2, K2), dtype=jnp.float32) * 0.05
    b2 = jax.random.normal(k3, (N2,), dtype=jnp.float32) * 0.1
    A2 = jax.random.normal(k4, (N2, r2), dtype=jnp.float32) * 0.01
    B2 = jax.random.normal(k5, (r2, K2), dtype=jnp.float32) * 0.01

    out2 = jax.block_until_ready(
        lora_linear(x2, w2, b2, A2, B2, scaling2, tm_max=128, tn_max=512, tk_max=256))
    ref2 = _reference(x2, w2, b2, A2, B2, scaling2)
    assert jnp.allclose(out2, ref2, atol=2e-3, rtol=2e-3), "mismatch vs reference (tiled)"

    # --- Test 3: awkward, non-aligned shapes exercising the padding path.
    M3, K3, N3, r3 = 37, 200, 300, 5
    scaling3 = 10 / r3
    k1, k2, k3, k4, k5 = jax.random.split(jax.random.PRNGKey(2), 5)
    x3 = jax.random.normal(k1, (M3, K3), dtype=jnp.float32)
    w3 = jax.random.normal(k2, (N3, K3), dtype=jnp.float32) * 0.05
    b3 = jax.random.normal(k3, (N3,), dtype=jnp.float32) * 0.1
    A3 = jax.random.normal(k4, (N3, r3), dtype=jnp.float32) * 0.01
    B3 = jax.random.normal(k5, (r3, K3), dtype=jnp.float32) * 0.01

    out3 = jax.block_until_ready(lora_linear(x3, w3, b3, A3, B3, scaling3))
    ref3 = _reference(x3, w3, b3, A3, B3, scaling3)
    assert jnp.allclose(out3, ref3, atol=2e-3, rtol=2e-3), "mismatch vs reference (padded)"

    print("KERNEL_OK")
</pallas_src>

<mosaic_0001>
module attributes {stable_mosaic.version = 11 : i64} {
  func.func @_lora_linear_kernel(%arg0: i32, %arg1: i32, %arg2: i32, %arg3: memref<8x128xf32, #tpu.memory_space<vmem>>, %arg4: memref<128x128xf32, #tpu.memory_space<vmem>>, %arg5: memref<1x128xf32, #tpu.memory_space<vmem>>, %arg6: memref<8x4xf32, #tpu.memory_space<vmem>>, %arg7: memref<4x128xf32, #tpu.memory_space<vmem>>, %arg8: memref<8x128xf32, #tpu.memory_space<vmem>>, %arg9: memref<8x128xf32, #tpu.memory_space<vmem>>) attributes {dimension_semantics = [#tpu.dimension_semantics<parallel>, #tpu.dimension_semantics<parallel>, #tpu.dimension_semantics<arbitrary>], iteration_bounds = array<i64: 1, 1, 1>, scalar_prefetch = 0 : i64, scratch_operands = 1 : i64, tpu.core_type = #tpu.core_type<tc>, window_params = [{transform_indices = @transform_0, window_bounds = array<i64: 8, 128>}, {transform_indices = @transform_1, window_bounds = array<i64: 128, 128>}, {transform_indices = @transform_2, window_bounds = array<i64: 1, 128>}, {transform_indices = @transform_3, window_bounds = array<i64: 8, 4>}, {transform_indices = @transform_4, window_bounds = array<i64: 4, 128>}, {transform_indices = @transform_5, window_bounds = array<i64: 8, 128>}]} {
    %c0_i32 = arith.constant 0 : i32
    %0 = arith.cmpi eq, %arg2, %c0_i32 : i32
    %1 = arith.extui %0 : i1 to i32
    %c0_i32_0 = arith.constant 0 : i32
    %2 = arith.cmpi ne, %1, %c0_i32_0 : i32
    scf.if %2 {
      %cst_10 = arith.constant 0.000000e+00 : f32
      %12 = vector.broadcast %cst_10 : f32 to vector<8x128xf32>
      %c0_11 = arith.constant 0 : index
      %c0_12 = arith.constant 0 : index
      %13 = vector.load %arg9[%c0_11, %c0_12] : memref<8x128xf32, #tpu.memory_space<vmem>>, vector<8x128xf32>
      tpu.vector_store %arg9[%c0_11, %c0_12], %12 {strides = array<i32>} : memref<8x128xf32, #tpu.memory_space<vmem>>, vector<8x128xf32>,
    } else {
    }
    %c0 = arith.constant 0 : index
    %c0_1 = arith.constant 0 : index
    %3 = vector.load %arg9[%c0, %c0_1] : memref<8x128xf32, #tpu.memory_space<vmem>>, vector<8x128xf32>
    %c0_2 = arith.constant 0 : index
    %c0_3 = arith.constant 0 : index
    %4 = vector.load %arg3[%c0_2, %c0_3] : memref<8x128xf32, #tpu.memory_space<vmem>>, vector<8x128xf32>
    %c0_4 = arith.constant 0 : index
    %c0_5 = arith.constant 0 : index
    %5 = vector.load %arg4[%c0_4, %c0_5] : memref<128x128xf32, #tpu.memory_space<vmem>>, vector<128x128xf32>
    %cst = arith.constant dense<0.000000e+00> : vector<8x128xf32>
    %6 = tpu.matmul %4, %5, %cst {dimension_numbers = #tpu.dot_dimension_numbers<[1], [1], [0], [0], [0, 0, 1, 0], [], []>} : vector<8x128xf32>, vector<128x128xf32>, vector<8x128xf32> -> vector<8x128xf32>
    %7 = arith.addf %3, %6 : vector<8x128xf32>
    %c0_6 = arith.constant 0 : index
    %c0_7 = arith.constant 0 : index
    %8 = vector.load %arg9[%c0_6, %c0_7] : memref<8x128xf32, #tpu.memory_space<vmem>>, vector<8x128xf32>
    tpu.vector_store %arg9[%c0_6, %c0_7], %7 {strides = array<i32>} : memref<8x128xf32, #tpu.memory_space<vmem>>, vector<8x128xf32>,
    %c0_i32_8 = arith.constant 0 : i32
    %9 = arith.cmpi eq, %arg2, %c0_i32_8 : i32
    %10 = arith.extui %9 : i1 to i32
    %c0_i32_9 = arith.constant 0 : i32
    %11 = arith.cmpi ne, %10, %c0_i32_9 : i32
    scf.if %11 {
      %c0_10 = arith.constant 0 : index
      %c0_11 = arith.constant 0 : index
      %12 = vector.load %arg6[%c0_10, %c0_11] : memref<8x4xf32, #tpu.memory_space<vmem>>, vector<8x4xf32>
      %c0_12 = arith.constant 0 : index
      %c0_13 = arith.constant 0 : index
      %13 = vector.load %arg7[%c0_12, %c0_13] : memref<4x128xf32, #tpu.memory_space<vmem>>, vector<4x128xf32>
      %14 = vector.extract_strided_slice %12 {offsets = [0, 0], sizes = [8, 1], strides = [1, 1]} : vector<8x4xf32> to vector<8x1xf32>
      %15 = vector.extract_strided_slice %13 {offsets = [0, 0], sizes = [1, 128], strides = [1, 1]} : vector<4x128xf32> to vector<1x128xf32>
      %16 = vector.broadcast %14 : vector<8x1xf32> to vector<8x128xf32>
      %17 = vector.broadcast %15 : vector<1x128xf32> to vector<8x128xf32>
      %18 = arith.mulf %16, %17 : vector<8x128xf32>
      %19 = vector.extract_strided_slice %12 {offsets = [0, 1], sizes = [8, 1], strides = [1, 1]} : vector<8x4xf32> to vector<8x1xf32>
      %20 = vector.extract_strided_slice %13 {offsets = [1, 0], sizes = [1, 128], strides = [1, 1]} : vector<4x128xf32> to vector<1x128xf32>
      %21 = vector.broadcast %19 : vector<8x1xf32> to vector<8x128xf32>
      %22 = vector.broadcast %20 : vector<1x128xf32> to vector<8x128xf32>
      %23 = arith.mulf %21, %22 : vector<8x128xf32>
      %24 = arith.addf %18, %23 : vector<8x128xf32>
      %25 = vector.extract_strided_slice %12 {offsets = [0, 2], sizes = [8, 1], strides = [1, 1]} : vector<8x4xf32> to vector<8x1xf32>
      %26 = vector.extract_strided_slice %13 {offsets = [2, 0], sizes = [1, 128], strides = [1, 1]} : vector<4x128xf32> to vector<1x128xf32>
      %27 = vector.broadcast %25 : vector<8x1xf32> to vector<8x128xf32>
      %28 = vector.broadcast %26 : vector<1x128xf32> to vector<8x128xf32>
      %29 = arith.mulf %27, %28 : vector<8x128xf32>
      %30 = arith.addf %24, %29 : vector<8x128xf32>
      %31 = vector.extract_strided_slice %12 {offsets = [0, 3], sizes = [8, 1], strides = [1, 1]} : vector<8x4xf32> to vector<8x1xf32>
      %32 = vector.extract_strided_slice %13 {offsets = [3, 0], sizes = [1, 128], strides = [1, 1]} : vector<4x128xf32> to vector<1x128xf32>
      %33 = vector.broadcast %31 : vector<8x1xf32> to vector<8x128xf32>
      %34 = vector.broadcast %32 : vector<1x128xf32> to vector<8x128xf32>
      %35 = arith.mulf %33, %34 : vector<8x128xf32>
      %36 = arith.addf %30, %35 : vector<8x128xf32>
      %c0_14 = arith.constant 0 : index
      %c0_15 = arith.constant 0 : index
      %37 = vector.load %arg9[%c0_14, %c0_15] : memref<8x128xf32, #tpu.memory_space<vmem>>, vector<8x128xf32>
      %c0_16 = arith.constant 0 : index
      %c0_17 = arith.constant 0 : index
      %38 = vector.load %arg5[%c0_16, %c0_17] : memref<1x128xf32, #tpu.memory_space<vmem>>, vector<1x128xf32>
      %39 = vector.broadcast %38 : vector<1x128xf32> to vector<8x128xf32>
      %40 = arith.addf %37, %39 : vector<8x128xf32>
      %41 = arith.addf %40, %36 : vector<8x128xf32>
      %c0_18 = arith.constant 0 : index
      %c0_19 = arith.constant 0 : index
      %42 = vector.load %arg8[%c0_18, %c0_19] : memref<8x128xf32, #tpu.memory_space<vmem>>, vector<8x128xf32>
      tpu.vector_store %arg8[%c0_18, %c0_19], %41 {strides = array<i32>} : memref<8x128xf32, #tpu.memory_space<vmem>>, vector<8x128xf32>,
    } else {
    }
    return
  }
  func.func @transform_0(%arg0: i32, %arg1: i32, %arg2: i32) -> (i32, i32) {
    %c0_i32 = arith.constant 0 : i32
    return %arg0, %arg2 : i32, i32
  }
  func.func @transform_1(%arg0: i32, %arg1: i32, %arg2: i32) -> (i32, i32) {
    %c0_i32 = arith.constant 0 : i32
    return %arg1, %arg2 : i32, i32
  }
  func.func @transform_2(%arg0: i32, %arg1: i32, %arg2: i32) -> (i32, i32) {
    %c0_i32 = arith.constant 0 : i32
    %c0_i32_0 = arith.constant 0 : i32
    return %c0_i32, %arg1 : i32, i32
  }
  func.func @transform_3(%arg0: i32, %arg1: i32, %arg2: i32) -> (i32, i32) {
    %c0_i32 = arith.constant 0 : i32
    %c0_i32_0 = arith.constant 0 : i32
    return %arg0, %c0_i32 : i32, i32
  }
  func.func @transform_4(%arg0: i32, %arg1: i32, %arg2: i32) -> (i32, i32) {
    %c0_i32 = arith.constant 0 : i32
    %c0_i32_0 = arith.constant 0 : i32
    return %c0_i32, %arg1 : i32, i32
  }
  func.func @transform_5(%arg0: i32, %arg1: i32, %arg2: i32) -> (i32, i32) {
    %c0_i32 = arith.constant 0 : i32
    return %arg0, %arg1 : i32, i32
  }
}

</mosaic_0001>

<bundles_post_ra>
// kernel: tpu_custom_call.1
= control target key start
LH: loop header
LB: loop body
LE: loop exit
PB: predicated region body
PF: predicated region fallthrough
CT: control target
= control target key end

     0   :  { %10 = vsyncpa [#allocation4], 0  ;;  %s262_s0 = inlined_call_operand.vmem [shape: f32[8,128], index: 0, kind: input, shape index: {}]   ;;  %s263_s1 = inlined_call_operand.hbm [shape: f32[128,128], index: 1, kind: input, shape index: {}]   ;;  %s264_s2 = inlined_call_operand.vmem [shape: f32[1,128], index: 2, kind: input, shape index: {}]   ;;  %s265_s3 = inlined_call_operand.vmem [shape: f32[8,4], index: 3, kind: input, shape index: {}]   ;;  %s266_s4 = inlined_call_operand.vmem [shape: f32[4,128], index: 4, kind: input, shape index: {}]   ;;  %s267_s5 = inlined_call_operand.hbm [shape: f32[8,128], index: 5, kind: output, shape index: {}]  }
   0x1   :  { %11 = vsyncpa [#allocation5], 0  ;;  %s18_s20 = sshll.u32 %s263_s1, 4  ;;  %s206_s21 = smov [#allocation3]   ;;  %s19_s20 = int_to_ptr.hbm [resolvable:$true] %s18_s20 }
   0x2   :  { %s20_s22 = sshll.u32 %s206_s21, 4  ;;  %s207_s23 = smov 128   ;;  %s21_s22 = int_to_ptr.vmem [resolvable:$true] %s20_s22 }
   0x3   :  { %s208_s24 = smov 8  }
   0x4   :  { %26 = dma.hbm_to_vmem [thread:$0]  %s19_s20, 2048, %s21_s22, [#allocation4], %s207_s23, %s207_s23, %s208_s24  }
   0x5   :  { %202 = dma.done.wait [#allocation4], 2048  }
   0x6   :  { %203 = vsyncadd [#allocation4], 4294965248  ;;  %v59_v0 = vld [vmem:[#allocation3 + $0x78] sm:$0xff]  ;;  %v58_v1 = vld [vmem:[#allocation3 + $0x70] sm:$0xff]  ;;  %v209_v7 = vmov 0   ;;  %v210_v9 = vmov 2  }
   0x7   :  { %60 = vmatpush.xpose.msra.mxu0 %v59_v0  ;;  %v57_v2 = vld [vmem:[#allocation3 + $0x68] sm:$0xff]  ;;  %v56_v3 = vld [vmem:[#allocation3 + $0x60] sm:$0xff]  ;;  %v55_v4 = vld [vmem:[#allocation3 + $0x58] sm:$0xff]  ;;  %148 = vset.pattern.permute.xlu0 %v209_v7  ;;  %v211_v11 = vmov 1   ;;  %v212_v13 = vmov 3   ;;  %s213_s30 = smov [#allocation6]  }
   0x8   :  { %v85_v5 = vld [vmem:[%s265_s3] sm:$0xff]  ;;  %v54_v6 = vld [vmem:[#allocation3 + $0x50] sm:$0xff]  ;;  %v53_v8 = vld [vmem:[#allocation3 + $0x48] sm:$0xff]  ;;  %150 = vset.pattern.permute.xlu1 %v210_v9  ;;  %s130_s8 = sshll.u32 %s267_s5, 4  ;;  %s131_s8 = int_to_ptr.hbm [resolvable:$true] %s130_s8 }
   0x9   :  { %89 = vperm.xlu0 %148, %v85_v5   ;;  %102 = vperm.xlu1 %150, %v85_v5   ;;  %v52_v10 = vld [vmem:[#allocation3 + $0x40] sm:$0xff]  ;;  %v51_v12 = vld [vmem:[#allocation3 + $0x38] sm:$0xff]  ;;  %v50_v14 = vld [vmem:[#allocation3 + $0x30] sm:$0xff] }
   0xa   :  { %v49_v15 = vld [vmem:[#allocation3 + $0x28] sm:$0xff]  ;;  %v48_v16 = vld [vmem:[#allocation3 + $0x20] sm:$0xff]  ;;  %v47_v17 = vld [vmem:[#allocation3 + $0x18] sm:$0xff] }
   0xb   :  { %61 = vmatpush.xpose.msra.mxu0 %v58_v1  ;;  %v46_v18 = vld [vmem:[#allocation3 + $0x10] sm:$0xff]  ;;  %v45_v19 = vld [vmem:[#allocation3 + $0x8] sm:$0xff]  ;;  %v44_v20 = vld [vmem:[#allocation3] sm:$0xff] }
   0xc   :  { %v43_v21 = vld [vmem:[%s262_s0] sm:$0xff] }
   0xd   :  { %v86_v23 = vld [vmem:[%s266_s4] sm:$0xf]  ;;  %s128_s4 = sshll.u32 %s213_s30, 4  ;;  %s129_s4 = int_to_ptr.vmem [resolvable:$true] %s128_s4 }
   0xe   :  { %v92_v25 = vperm.slane %v86_v23, 0  ;;  %v98_v26 = vperm.slane %v86_v23, 1  ;;  %v105_v29 = vperm.slane %v86_v23, 2  ;;  %v112_v33 = vperm.slane %v86_v23, 3  ;;  %v153_v37 = vld [vmem:[%s264_s2] ss:$0 sm:$0xff] }
   0xf   :  { %62 = vmatpush.xpose.msra.mxu0 %v57_v2 }
  0x11   :  { %149 = vset.pattern.permute.xlu0 %v211_v11  ;;  %151 = vset.pattern.permute.xlu1 %v212_v13 }
  0x12   :  { %95 = vperm.xlu0 %149, %v85_v5   ;;  %109 = vperm.xlu1 %151, %v85_v5  }
  0x13   :  { %63 = vmatpush.xpose.msra.mxu0 %v56_v3 }
  0x17   :  { %64 = vmatpush.xpose.msra.mxu0 %v55_v4 }
  0x1a   :  { %152 = vset.pattern.permute.xlu0 %v212_v13 }
  0x1b   :  { %65 = vmatpush.xpose.msra.mxu0 %v54_v6 }
  0x1f   :  { %66 = vmatpush.xpose.msra.mxu0 %v53_v8 }
  0x23   :  { %67 = vmatpush.xpose.msra.mxu0 %v52_v10 }
  0x27   :  { %68 = vmatpush.xpose.msra.mxu0 %v51_v12 }
  0x2b   :  { %69 = vmatpush.xpose.msra.mxu0 %v50_v14 }
  0x2f   :  { %70 = vmatpush.xpose.msra.mxu0 %v49_v15 }
  0x33   :  { %71 = vmatpush.xpose.msra.mxu0 %v48_v16 }
  0x37   :  { %72 = vmatpush.xpose.msra.mxu0 %v47_v17 }
  0x3b   :  { %73 = vmatpush.xpose.msra.mxu0 %v46_v18 }
  0x3f   :  { %74 = vmatpush.xpose.msra.mxu0 %v45_v19 }
  0x43   :  { %75 = vmatpush.xpose.msra.mxu0 %v44_v20 }
  0x46   :  { %76 = vmatmul.f32.vlgmr.msra.gmra.mxu0 %v43_v21 }
  0x7b   :  { %v90_v22 = vpop.permute.xlu0 %89  ;;  %v103_v24 = vpop.permute.xlu1 %102 }
  0x7c   :  { %v93_v28 = vmul.f32 %v92_v25, %v90_v22  ;;  %v106_v31 = vmul.f32 %v105_v29, %v103_v24 }
  0x84   :  { %v96_v27 = vpop.permute.xlu0 %95  ;;  %v110_v34 = vpop.permute.xlu1 %109 }
  0x85   :  { %v99_v30 = vmul.f32 %v98_v26, %v96_v27  ;;  %v113_v36 = vmul.f32 %v112_v33, %v110_v34 }
  0x87   :  { %v100_v32 = vadd.f32 %v99_v30, %v93_v28 }
  0x89   :  { %v107_v35 = vadd.f32 %v106_v31, %v100_v32 }
  0x8b   :  { %v114_v39 = vadd.f32 %v113_v36, %v107_v35 }
  0xc3   :  { %v77_v38 = vpop.f32.mrf.mxu0 }
  0xc4   :  { %v120_v40 = vadd.f32 %v153_v37, %v77_v38 }
  0xc6   :  { %v121_v41 = vadd.f32 %v120_v40, %v114_v39 }
  0xc8   :  { %122 = vst [vmem:[#allocation6] sm:$0xff] %v121_v41 }
  0xc9   :  { %133 = dma.vmem_to_hbm [thread:$0]  %s129_s4, 128, %s131_s8, [#allocation5]  }
  0xca   :  { %204 = dma.done.wait [#allocation5], 128  }
  0xcb   :  { %205 = vsyncadd [#allocation5], 4294967168 }
  0xcc   :  { %138 = vsyncpa [#allocation4], 1 }
  0xcd   :  { %139 = vsyncpa [#allocation5], 1 }

</bundles_post_ra>
